<compile_context>
chip_gen: v6e
topology: v6e:2x2x1
jax: 0.10.0
libtpu: 0.0.40
codegen_flags: <defaults>
</compile_context>

<pallas_src>
import jax
import jax.numpy as jnp
from jax.experimental import pallas as pl
from jax.experimental.pallas import tpu as pltpu

LANE = 128
D_IN = 28 * 28
N_OUT = 7


def _round_up(a, m):
    return (a + m - 1) // m * m


def encoder_kernel(x_ref, w1_ref, b1_ref, w2_ref, b2_ref, w3_ref, b3_ref, o_ref):
    # In-kernel cast to bf16 (no-op if x already bf16); cheap VPU work hidden
    # under the x DMA / MXU.
    x = x_ref[...].astype(jnp.bfloat16)
    # Layer 1: [tb, 784](bf16) @ [784, 256](bf16) -> f32 acc; bias+ReLU in f32
    h1 = jnp.dot(x, w1_ref[...], preferred_element_type=jnp.float32)
    h1 = jnp.maximum(h1 + b1_ref[...], 0.0)
    # Layer 2: [tb, 256] @ [256, 128]
    h2 = jnp.dot(h1.astype(jnp.bfloat16), w2_ref[...],
                 preferred_element_type=jnp.float32)
    h2 = jnp.maximum(h2 + b2_ref[...], 0.0)
    # Layer 3: [tb, 128] @ [128, 128]  (only first 7 output lanes are real)
    h3 = jnp.dot(h2.astype(jnp.bfloat16), w3_ref[...],
                 preferred_element_type=jnp.float32)
    # bf16 writeback: halves output HBM traffic, still full 128-lane unmasked vst.
    o_ref[...] = jnp.maximum(h3 + b3_ref[...], 0.0).astype(o_ref.dtype)


def init_params(key):
    """Deterministic init mirroring nn.Linear default (uniform +-1/sqrt(fan_in)).

    Weights stored as [in_features, out_features] so y = x @ W + b matches
    PyTorch's x @ W.T with W [out, in].
    """
    dims = [(D_IN, 196), (196, 49), (49, N_OUT)]
    params = {}
    for idx, (fan_in, fan_out) in enumerate(dims, start=1):
        key, kw, kb = jax.random.split(key, 3)
        bound = 1.0 / jnp.sqrt(fan_in)
        params[f"w{idx}"] = jax.random.uniform(
            kw, (fan_in, fan_out), jnp.float32, -bound, bound)
        params[f"b{idx}"] = jax.random.uniform(
            kb, (1, fan_out), jnp.float32, -bound, bound)
    return params


def prepare_params(params):
    """Pad feature dims to lane (128) multiples once; cast weights to bf16.

    Zero padding is exact: padded K-rows contribute 0 to the dot and padded
    N-columns give ReLU(0 + 0) = 0, so downstream layers are unaffected.
    Biases stay f32 (bias add / ReLU run in f32 on all generations).
    """
    def pad_to(a, shape):
        pads = [(0, t - s) for s, t in zip(a.shape, shape)]
        return jnp.pad(a, pads)

    n1p = _round_up(196, LANE)     # 256
    n2p = _round_up(49, LANE)      # 128
    n3p = _round_up(N_OUT, LANE)   # 128

    return {
        "w1": pad_to(params["w1"], (D_IN, n1p)).astype(jnp.bfloat16),
        "b1": pad_to(params["b1"], (1, n1p)),
        "w2": pad_to(params["w2"], (n1p, n2p)).astype(jnp.bfloat16),
        "b2": pad_to(params["b2"], (1, n2p)),
        "w3": pad_to(params["w3"], (n2p, n3p)).astype(jnp.bfloat16),
        "b3": pad_to(params["b3"], (1, n3p)),
    }


def encoder_forward(x, prepped, *, tb=1024):
    """x: [B, 784] float32 (or bfloat16). Returns [B, 7] float32."""
    B, d_in = x.shape
    assert d_in == D_IN
    w1, b1 = prepped["w1"], prepped["b1"]
    w2, b2 = prepped["w2"], prepped["b2"]
    w3, b3 = prepped["w3"], prepped["b3"]
    n_out_pad = w3.shape[1]  # 128

    # Batch tiling:
    #  * tile rows are a multiple of 16 (works for f32 input sublanes and the
    #    bf16 output's (16,128) tiles),
    #  * no wrapper pad -- ragged last tile handled by Pallas (OOB writes dropped),
    #  * for large batches, cap the tile so there are >=2 grid steps and the
    #    "parallel" batch axis can shard across both TensorCores on v7x.
    tb_eff = min(tb, _round_up(B, 16))
    if B >= 512:
        tb_eff = min(tb_eff, max(256, _round_up(pl.cdiv(B, 2), 256)))
    grid = (pl.cdiv(B, tb_eff),)

    # Constant block index -> weights/biases stay resident in VMEM across grid.
    resident = lambda arr: pl.BlockSpec(arr.shape, lambda i: (0, 0))

    out = pl.pallas_call(
        encoder_kernel,
        out_shape=jax.ShapeDtypeStruct((B, n_out_pad), jnp.bfloat16),
        grid_spec=pltpu.PrefetchScalarGridSpec(
            num_scalar_prefetch=0,
            grid=grid,
            in_specs=[
                pl.BlockSpec((tb_eff, D_IN), lambda i: (i, 0)),  # streamed x tile
                resident(w1), resident(b1),
                resident(w2), resident(b2),
                resident(w3), resident(b3),
            ],
            out_specs=pl.BlockSpec((tb_eff, n_out_pad), lambda i: (i, 0)),
        ),
        compiler_params=pltpu.CompilerParams(
            # "parallel" batch axis -> megacore sharding on v7x (verify split in
            # a trace; switch to pltpu.CORE_PARALLEL if the hint isn't honored).
            dimension_semantics=("parallel",),
            vmem_limit_bytes=32 * 1024 * 1024,  # headroom for tb=1024 f32 x on v5e
        ),
    )(x, w1, b1, w2, b2, w3, b3)

    # Slice off padded lanes / cast for the consumer (fused when jitted with it).
    return out[:B, :N_OUT].astype(jnp.float32)


def encoder_ref(x, params):
    """Pure-f32 reference matching the PyTorch module semantics."""
    h = jnp.maximum(x @ params["w1"] + params["b1"], 0.0)
    h = jnp.maximum(h @ params["w2"] + params["b2"], 0.0)
    return jnp.maximum(h @ params["w3"] + params["b3"], 0.0)


if __name__ == "__main__":
    key = jax.random.PRNGKey(0)
    key, kx = jax.random.split(key)
    params = init_params(key)
    prepped = prepare_params(params)

    B = 16
    # `image.view(image.size(0), -1)` -> flattened MNIST-like input [B, 784]
    x = jax.random.uniform(kx, (B, D_IN), jnp.float32)

    fwd = jax.jit(lambda xx: encoder_forward(xx, prepped))
    z = jax.block_until_ready(fwd(x))

    z_ref = encoder_ref(x, params)
    assert z.shape == (B, N_OUT)
    # Tolerance loosened vs pure-f32 reference: MXU inputs and the output
    # writeback are bf16 (f32 accumulation keeps error small for this ReLU MLP).
    assert jnp.allclose(z, z_ref, atol=2e-2, rtol=2e-2), float(
        jnp.max(jnp.abs(z - z_ref)))

    print("KERNEL_OK")
</pallas_src>

<mosaic_0001>
module attributes {stable_mosaic.version = 11 : i64} {
  func.func @encoder_kernel(%arg0: i32, %arg1: memref<16x784xf32, #tpu.memory_space<vmem>>, %arg2: memref<784x256xbf16, #tpu.memory_space<vmem>>, %arg3: memref<1x256xf32, #tpu.memory_space<vmem>>, %arg4: memref<256x128xbf16, #tpu.memory_space<vmem>>, %arg5: memref<1x128xf32, #tpu.memory_space<vmem>>, %arg6: memref<128x128xbf16, #tpu.memory_space<vmem>>, %arg7: memref<1x128xf32, #tpu.memory_space<vmem>>, %arg8: memref<16x128xbf16, #tpu.memory_space<vmem>>) attributes {dimension_semantics = [#tpu.dimension_semantics<parallel>], iteration_bounds = array<i64: 1>, scalar_prefetch = 0 : i64, scratch_operands = 0 : i64, tpu.core_type = #tpu.core_type<tc>, window_params = [{transform_indices = @transform_0, window_bounds = array<i64: 16, 784>}, {pipeline_mode = #tpu.pipeline_mode<synchronous>, transform_indices = @transform_1, window_bounds = array<i64: 784, 256>}, {pipeline_mode = #tpu.pipeline_mode<synchronous>, transform_indices = @transform_2, window_bounds = array<i64: 1, 256>}, {pipeline_mode = #tpu.pipeline_mode<synchronous>, transform_indices = @transform_3, window_bounds = array<i64: 256, 128>}, {pipeline_mode = #tpu.pipeline_mode<synchronous>, transform_indices = @transform_4, window_bounds = array<i64: 1, 128>}, {pipeline_mode = #tpu.pipeline_mode<synchronous>, transform_indices = @transform_5, window_bounds = array<i64: 128, 128>}, {pipeline_mode = #tpu.pipeline_mode<synchronous>, transform_indices = @transform_6, window_bounds = array<i64: 1, 128>}, {transform_indices = @transform_7, window_bounds = array<i64: 16, 128>}]} {
    %c0 = arith.constant 0 : index
    %c0_0 = arith.constant 0 : index
    %0 = vector.load %arg1[%c0, %c0_0] : memref<16x784xf32, #tpu.memory_space<vmem>>, vector<16x784xf32>
    %1 = arith.truncf %0 : vector<16x784xf32> to vector<16x784xbf16>
    %c0_1 = arith.constant 0 : index
    %c0_2 = arith.constant 0 : index
    %2 = vector.load %arg2[%c0_1, %c0_2] : memref<784x256xbf16, #tpu.memory_space<vmem>>, vector<784x256xbf16>
    %cst = arith.constant dense<0.000000e+00> : vector<16x256xf32>
    %3 = tpu.matmul %1, %2, %cst {dimension_numbers = #tpu.dot_dimension_numbers<[1], [0], [0], [1], [0, 0, 1, 1], [], []>} : vector<16x784xbf16>, vector<784x256xbf16>, vector<16x256xf32> -> vector<16x256xf32>
    %c0_3 = arith.constant 0 : index
    %c0_4 = arith.constant 0 : index
    %4 = vector.load %arg3[%c0_3, %c0_4] : memref<1x256xf32, #tpu.memory_space<vmem>>, vector<1x256xf32>
    %5 = vector.broadcast %4 : vector<1x256xf32> to vector<16x256xf32>
    %6 = arith.addf %3, %5 : vector<16x256xf32>
    %cst_5 = arith.constant 0.000000e+00 : f32
    %7 = vector.broadcast %cst_5 : f32 to vector<16x256xf32>
    %8 = arith.maximumf %6, %7 : vector<16x256xf32>
    %9 = arith.truncf %8 : vector<16x256xf32> to vector<16x256xbf16>
    %c0_6 = arith.constant 0 : index
    %c0_7 = arith.constant 0 : index
    %10 = vector.load %arg4[%c0_6, %c0_7] : memref<256x128xbf16, #tpu.memory_space<vmem>>, vector<256x128xbf16>
    %cst_8 = arith.constant dense<0.000000e+00> : vector<16x128xf32>
    %11 = tpu.matmul %9, %10, %cst_8 {dimension_numbers = #tpu.dot_dimension_numbers<[1], [0], [0], [1], [0, 0, 1, 1], [], []>} : vector<16x256xbf16>, vector<256x128xbf16>, vector<16x128xf32> -> vector<16x128xf32>
    %c0_9 = arith.constant 0 : index
    %c0_10 = arith.constant 0 : index
    %12 = vector.load %arg5[%c0_9, %c0_10] : memref<1x128xf32, #tpu.memory_space<vmem>>, vector<1x128xf32>
    %13 = vector.broadcast %12 : vector<1x128xf32> to vector<16x128xf32>
    %14 = arith.addf %11, %13 : vector<16x128xf32>
    %cst_11 = arith.constant 0.000000e+00 : f32
    %15 = vector.broadcast %cst_11 : f32 to vector<16x128xf32>
    %16 = arith.maximumf %14, %15 : vector<16x128xf32>
    %17 = arith.truncf %16 : vector<16x128xf32> to vector<16x128xbf16>
    %c0_12 = arith.constant 0 : index
    %c0_13 = arith.constant 0 : index
    %18 = vector.load %arg6[%c0_12, %c0_13] : memref<128x128xbf16, #tpu.memory_space<vmem>>, vector<128x128xbf16>
    %cst_14 = arith.constant dense<0.000000e+00> : vector<16x128xf32>
    %19 = tpu.matmul %17, %18, %cst_14 {dimension_numbers = #tpu.dot_dimension_numbers<[1], [0], [0], [1], [0, 0, 1, 1], [], []>} : vector<16x128xbf16>, vector<128x128xbf16>, vector<16x128xf32> -> vector<16x128xf32>
    %c0_15 = arith.constant 0 : index
    %c0_16 = arith.constant 0 : index
    %20 = vector.load %arg7[%c0_15, %c0_16] : memref<1x128xf32, #tpu.memory_space<vmem>>, vector<1x128xf32>
    %21 = vector.broadcast %20 : vector<1x128xf32> to vector<16x128xf32>
    %22 = arith.addf %19, %21 : vector<16x128xf32>
    %cst_17 = arith.constant 0.000000e+00 : f32
    %23 = vector.broadcast %cst_17 : f32 to vector<16x128xf32>
    %24 = arith.maximumf %22, %23 : vector<16x128xf32>
    %25 = arith.truncf %24 : vector<16x128xf32> to vector<16x128xbf16>
    %c0_18 = arith.constant 0 : index
    %c0_19 = arith.constant 0 : index
    %26 = vector.load %arg8[%c0_18, %c0_19] : memref<16x128xbf16, #tpu.memory_space<vmem>>, vector<16x128xbf16>
    tpu.vector_store %arg8[%c0_18, %c0_19], %25 {strides = array<i32>} : memref<16x128xbf16, #tpu.memory_space<vmem>>, vector<16x128xbf16>,
    return
  }
  func.func @transform_0(%arg0: i32) -> (i32, i32) {
    %c0_i32 = arith.constant 0 : i32
    %c0_i32_0 = arith.constant 0 : i32
    return %arg0, %c0_i32 : i32, i32
  }
  func.func @transform_1(%arg0: i32) -> (i32, i32) {
    %c0_i32 = arith.constant 0 : i32
    %c0_i32_0 = arith.constant 0 : i32
    %c0_i32_1 = arith.constant 0 : i32
    return %c0_i32, %c0_i32_0 : i32, i32
  }
  func.func @transform_2(%arg0: i32) -> (i32, i32) {
    %c0_i32 = arith.constant 0 : i32
    %c0_i32_0 = arith.constant 0 : i32
    %c0_i32_1 = arith.constant 0 : i32
    return %c0_i32, %c0_i32_0 : i32, i32
  }
  func.func @transform_3(%arg0: i32) -> (i32, i32) {
    %c0_i32 = arith.constant 0 : i32
    %c0_i32_0 = arith.constant 0 : i32
    %c0_i32_1 = arith.constant 0 : i32
    return %c0_i32, %c0_i32_0 : i32, i32
  }
  func.func @transform_4(%arg0: i32) -> (i32, i32) {
    %c0_i32 = arith.constant 0 : i32
    %c0_i32_0 = arith.constant 0 : i32
    %c0_i32_1 = arith.constant 0 : i32
    return %c0_i32, %c0_i32_0 : i32, i32
  }
  func.func @transform_5(%arg0: i32) -> (i32, i32) {
    %c0_i32 = arith.constant 0 : i32
    %c0_i32_0 = arith.constant 0 : i32
    %c0_i32_1 = arith.constant 0 : i32
    return %c0_i32, %c0_i32_0 : i32, i32
  }
  func.func @transform_6(%arg0: i32) -> (i32, i32) {
    %c0_i32 = arith.constant 0 : i32
    %c0_i32_0 = arith.constant 0 : i32
    %c0_i32_1 = arith.constant 0 : i32
    return %c0_i32, %c0_i32_0 : i32, i32
  }
  func.func @transform_7(%arg0: i32) -> (i32, i32) {
    %c0_i32 = arith.constant 0 : i32
    %c0_i32_0 = arith.constant 0 : i32
    return %arg0, %c0_i32 : i32, i32
  }
}

</mosaic_0001>

<bundles_post_ra>
// kernel: _lambda_.1
= control target key start
LH: loop header
LB: loop body
LE: loop exit
PB: predicated region body
PF: predicated region fallthrough
CT: control target
= control target key end

     0   :  { %12 = vsyncpa [#allocation3], 0  ;;  %s1736_s0 = inlined_call_operand.hbm [shape: f32[16,784], index: 0, kind: input, shape index: {}]   ;;  %s1737_s1 = inlined_call_operand.hbm [shape: bf16[784,256], index: 1, kind: input, shape index: {}]   ;;  %s1738_s2 = inlined_call_operand.vmem [shape: f32[1,256], index: 2, kind: input, shape index: {}]   ;;  %s1739_s3 = inlined_call_operand.hbm [shape: bf16[256,128], index: 3, kind: input, shape index: {}]   ;;  %s1740_s4 = inlined_call_operand.vmem [shape: f32[1,128], index: 4, kind: input, shape index: {}]   ;;  %s1741_s5 = inlined_call_operand.hbm [shape: bf16[128,128], index: 5, kind: input, shape index: {}]   ;;  %s1742_s6 = inlined_call_operand.vmem [shape: f32[1,128], index: 6, kind: input, shape index: {}]   ;;  %s1743_s7 = inlined_call_operand.vmem [shape: bf16[16,128], index: 7, kind: output, shape index: {}]  }
   0x1   :  { %13 = vsyncpa [#allocation5], 0 }
   0x2   :  { %14 = vsyncpa [#allocation8], 0  ;;  %s1650_s24 = smov [#allocation4]  }
   0x3   :  { %s32_s25 = sshll.u32 %s1650_s24, 4  ;;  %s33_s25 = int_to_ptr.vmem [resolvable:$true] %s32_s25 }
   0x4   :  { %s1572_s26 = scalar_lea.vmem %s33_s25, 12544  ;;  %p1577_p1 = scmp.lt.s32.totalorder %s33_s25, %s33_s25 }
   0x5   :  { %p1573_p0 = scmp.ne.s32.totalorder %s33_s25, %s1572_s26  ;;  %p1578_p2 = scmp.lt.s32.totalorder %s1572_s26, %s1572_s26 }
   0x7   :  { %p1579_p3 = por %p1578_p2, %p1577_p1 }
   0x9   :  { %p1580_p4 = pnand %p1579_p3, %p1573_p0 }
   0xb   :  { %1583 = shalt.err (!%p1580_p4)
}
   0xc   :  { %s1651_s27 = smov 128   ;;  %s1652_s28 = smov 8  }
   0xd   :  { %38 = dma.hbm_to_vmem [thread:$0]  %s1737_s1, 12544, %s33_s25, [#allocation5], %s1651_s27, %s1651_s27, %s1652_s28  }
   0xe   :  { %s1653_s8 = smov [#allocation2]  }
   0xf   :  { %s20_s9 = sshll.u32 %s1653_s8, 4  ;;  %s21_s9 = int_to_ptr.vmem [resolvable:$true] %s20_s9 }
  0x10   :  { %s1592_s10 = scalar_lea.vmem %s21_s9, 1792  ;;  %p1597_p6 = scmp.lt.s32.totalorder %s21_s9, %s21_s9 }
  0x11   :  { %p1593_p5 = scmp.ne.s32.totalorder %s21_s9, %s1592_s10  ;;  %p1598_p7 = scmp.lt.s32.totalorder %s1592_s10, %s1592_s10 }
  0x13   :  { %p1599_p8 = por %p1598_p7, %p1597_p6 }
  0x15   :  { %p1600_p9 = pnand %p1599_p8, %p1593_p5 }
  0x17   :  { %1603 = shalt.err (!%p1600_p9)
}
  0x18   :  { %s1654_s11 = smov 896   ;;  %s1655_s12 = smov 56  }
  0x19   :  { %26 = dma.hbm_to_vmem [thread:$0]  %s1736_s0, 1792, %s21_s9, [#allocation3], %s1654_s11, %s1654_s11, %s1655_s12  }
  0x1a   :  { %s1656_s15 = smov [#allocation6]  }
  0x1b   :  { %s46_s16 = sshll.u32 %s1656_s15, 4  ;;  %s47_s16 = int_to_ptr.vmem [resolvable:$true] %s46_s16 }
  0x1c   :  { %s1612_s1 = scalar_lea.vmem %s47_s16, 2048  ;;  %p1617_p11 = scmp.lt.s32.totalorder %s47_s16, %s47_s16 }
  0x1d   :  { %p1613_p10 = scmp.ne.s32.totalorder %s47_s16, %s1612_s1  ;;  %p1618_p12 = scmp.lt.s32.totalorder %s1612_s1, %s1612_s1 }
  0x1f   :  { %p1619_p13 = por %p1618_p12, %p1617_p11 }
  0x21   :  { %p1620_p0 = pnand %p1619_p13, %p1613_p10 }
  0x23   :  { %1623 = shalt.err (!%p1620_p0)
}
  0x24   :  { %s1657_s17 = smov 64   ;;  %s1658_s18 = smov 4  }
  0x25   :  { %52 = dma.hbm_to_vmem [thread:$0]  %s1739_s3, 2048, %s47_s16, [#allocation5], %s1657_s17, %s1657_s17, %s1658_s18  }
  0x26   :  { %s1659_s21 = smov [#allocation7]  }
  0x27   :  { %s60_s22 = sshll.u32 %s1659_s21, 4  ;;  %s61_s22 = int_to_ptr.vmem [resolvable:$true] %s60_s22 }
  0x28   :  { %s1632_s0 = scalar_lea.vmem %s61_s22, 1024  ;;  %p1637_p2 = scmp.lt.s32.totalorder %s61_s22, %s61_s22 }
  0x29   :  { %p1633_p1 = scmp.ne.s32.totalorder %s61_s22, %s1632_s0  ;;  %p1638_p3 = scmp.lt.s32.totalorder %s1632_s0, %s1632_s0 }
  0x2b   :  { %p1639_p4 = por %p1638_p3, %p1637_p2 }
  0x2d   :  { %p1640_p5 = pnand %p1639_p4, %p1633_p1 }
  0x2f   :  { %1643 = shalt.err (!%p1640_p5)
}
  0x30   :  { %66 = dma.hbm_to_vmem [thread:$0]  %s1741_s5, 1024, %s61_s22, [#allocation8], %s1657_s17, %s1657_s17, %s1658_s18  }
  0x31   :  { %1644 = dma.done.wait [#allocation3], 1792  }
  0x32   :  { %1645 = vsyncadd [#allocation3], 4294965504 }
  0x33   :  { %1646 = dma.done.wait [#allocation5], 14592  }
  0x34   :  { %1647 = vsyncadd [#allocation5], 4294952704 }
  0x35   :  { %1648 = dma.done.wait [#allocation8], 1024  }
  0x36   :  { %1649 = vsyncadd [#allocation8], 4294966272  ;;  %v1393_v0 = vld [vmem:[#allocation4 + $0x74] ss:$8 sps:$4 sm:$0xff]   ;;  %v1395_v1 = vld [vmem:[#allocation4 + $0x70] ss:$8 sps:$4 sm:$0xff]  }
  0x37   :  { %707 = vmatprep.subr.bf16.mxu0 %v1393_v0  ;;  %v1396_v2 = vld [vmem:[#allocation4 + $0x174] ss:$8 sps:$4 sm:$0xff]   ;;  %v1398_v3 = vld [vmem:[#allocation4 + $0x170] ss:$8 sps:$4 sm:$0xff]   ;;  %v1399_v4 = vld [vmem:[#allocation4 + $0x64] ss:$8 sps:$4 sm:$0xff]  }
  0x38   :  { %708 = vmatpush1.bf16.msra.mxu0 %v1395_v1  ;;  %v1401_v5 = vld [vmem:[#allocation4 + $0x60] ss:$8 sps:$4 sm:$0xff]   ;;  %750 = vmatprep.subr.bf16.mxu1 %v1396_v2  ;;  %v1402_v6 = vld [vmem:[#allocation4 + $0x164] ss:$8 sps:$4 sm:$0xff]   ;;  %v1405_v8 = vld [vmem:[#allocation4 + $0x54] ss:$8 sps:$4 sm:$0xff]  }
  0x39   :  { %751 = vmatpush1.bf16.msra.mxu1 %v1398_v3  ;;  %709 = vmatprep.subr.bf16.mxu0 %v1399_v4  ;;  %v1404_v7 = vld [vmem:[#allocation4 + $0x160] ss:$8 sps:$4 sm:$0xff]   ;;  %v1407_v9 = vld [vmem:[#allocation4 + $0x50] ss:$8 sps:$4 sm:$0xff]   ;;  %v1408_v10 = vld [vmem:[#allocation4 + $0x154] ss:$8 sps:$4 sm:$0xff]  }
  0x3a   :  { %752 = vmatprep.subr.bf16.mxu1 %v1402_v6  ;;  %v1411_v11 = vld [vmem:[#allocation4 + $0x44] ss:$8 sps:$4 sm:$0xff]   ;;  %v1410_v12 = vld [vmem:[#allocation4 + $0x150] ss:$8 sps:$4 sm:$0xff]   ;;  %v1413_v14 = vld [vmem:[#allocation4 + $0x40] ss:$8 sps:$4 sm:$0xff]  }
  0x3b   :  { %v1414_v13 = vld [vmem:[#allocation4 + $0x144] ss:$8 sps:$4 sm:$0xff]   ;;  %v1417_v15 = vld [vmem:[#allocation4 + $0x34] ss:$8 sps:$4 sm:$0xff]   ;;  %v1416_v16 = vld [vmem:[#allocation4 + $0x140] ss:$8 sps:$4 sm:$0xff]  }
  0x3c   :  { %710 = vmatpush1.bf16.msra.mxu0 %v1401_v5  ;;  %v1420_v17 = vld [vmem:[#allocation4 + $0x134] ss:$8 sps:$4 sm:$0xff]   ;;  %v1419_v18 = vld [vmem:[#allocation4 + $0x30] ss:$8 sps:$4 sm:$0xff]   ;;  %v1423_v19 = vld [vmem:[#allocation4 + $0x24] ss:$8 sps:$4 sm:$0xff]  }
  0x3d   :  { %711 = vmatprep.subr.bf16.mxu0 %v1405_v8  ;;  %753 = vmatpush1.bf16.msra.mxu1 %v1404_v7  ;;  %v1422_v20 = vld [vmem:[#allocation4 + $0x130] ss:$8 sps:$4 sm:$0xff]   ;;  %v1426_v21 = vld [vmem:[#allocation4 + $0x124] ss:$8 sps:$4 sm:$0xff]   ;;  %v1425_v22 = vld [vmem:[#allocation4 + $0x20] ss:$8 sps:$4 sm:$0xff]  }
  0x3e   :  { %754 = vmatprep.subr.bf16.mxu1 %v1408_v10  ;;  %v1429_v23 = vld [vmem:[#allocation4 + $0x14] ss:$8 sps:$4 sm:$0xff]   ;;  %v1428_v24 = vld [vmem:[#allocation4 + $0x120] ss:$8 sps:$4 sm:$0xff]   ;;  %v1431_v26 = vld [vmem:[#allocation4 + $0x10] ss:$8 sps:$4 sm:$0xff]  }
  0x3f   :  { %v1432_v25 = vld [vmem:[#allocation4 + $0x114] ss:$8 sps:$4 sm:$0xff]   ;;  %v1435_v27 = vld [vmem:[#allocation4 + $0x4] ss:$8 sps:$4 sm:$0xff]   ;;  %v1434_v28 = vld [vmem:[#allocation4 + $0x110] ss:$8 sps:$4 sm:$0xff]  }
  0x40   :  { %712 = vmatpush1.bf16.msra.mxu0 %v1407_v9  ;;  %v1438_v29 = vld [vmem:[#allocation4 + $0x104] ss:$8 sps:$4 sm:$0xff]   ;;  %v1437_v30 = vld [vmem:[#allocation4] ss:$8 sps:$4 sm:$0xff]   ;;  %v1441_v31 = vld [vmem:[#allocation4 + $0xf4] ss:$8 sps:$4 sm:$0xff]  }
  0x41   :  { %713 = vmatprep.subr.bf16.mxu0 %v1411_v11  ;;  %755 = vmatpush1.bf16.msra.mxu1 %v1410_v12  ;;  %v1440_v32 = vld [vmem:[#allocation4 + $0x100] ss:$8 sps:$4 sm:$0xff]   ;;  %v1444_v33 = vld [vmem:[#allocation4 + $0x1f4] ss:$8 sps:$4 sm:$0xff]   ;;  %v1443_v34 = vld [vmem:[#allocation4 + $0xf0] ss:$8 sps:$4 sm:$0xff]  }
  0x42   :  { %756 = vmatprep.subr.bf16.mxu1 %v1414_v13  ;;  %v1447_v35 = vld [vmem:[#allocation4 + $0xe4] ss:$8 sps:$4 sm:$0xff]   ;;  %v1446_v36 = vld [vmem:[#allocation4 + $0x1f0] ss:$8 sps:$4 sm:$0xff]   ;;  %v1449_v38 = vld [vmem:[#allocation4 + $0xe0] ss:$8 sps:$4 sm:$0xff]  }
  0x43   :  { %v1450_v37 = vld [vmem:[#allocation4 + $0x1e4] ss:$8 sps:$4 sm:$0xff]   ;;  %v1453_v39 = vld [vmem:[#allocation4 + $0xd4] ss:$8 sps:$4 sm:$0xff]   ;;  %v1452_v40 = vld [vmem:[#allocation4 + $0x1e0] ss:$8 sps:$4 sm:$0xff]  }
  0x44   :  { %714 = vmatpush1.bf16.msra.mxu0 %v1413_v14  ;;  %v1456_v41 = vld [vmem:[#allocation4 + $0x1d4] ss:$8 sps:$4 sm:$0xff]   ;;  %v1455_v42 = vld [vmem:[#allocation4 + $0xd0] ss:$8 sps:$4 sm:$0xff]   ;;  %v1459_v43 = vld [vmem:[#allocation4 + $0xc4] ss:$8 sps:$4 sm:$0xff]  }
  0x45   :  { %715 = vmatprep.subr.bf16.mxu0 %v1417_v15  ;;  %757 = vmatpush1.bf16.msra.mxu1 %v1416_v16  ;;  %v1458_v44 = vld [vmem:[#allocation4 + $0x1d0] ss:$8 sps:$4 sm:$0xff]   ;;  %v1462_v45 = vld [vmem:[#allocation4 + $0x1c4] ss:$8 sps:$4 sm:$0xff]   ;;  %v1461_v48 = vld [vmem:[#allocation4 + $0xc0] ss:$8 sps:$4 sm:$0xff]  }
  0x46   :  { %758 = vmatprep.subr.bf16.mxu1 %v1420_v17  ;;  %v83_v46 = vld [vmem:[#allocation2 + $0x8] sm:$0xff]  ;;  %v90_v47 = vld [vmem:[#allocation2 + $0x40] sm:$0xff]  ;;  %v1464_v51 = vld [vmem:[#allocation4 + $0x1c0] ss:$8 sps:$4 sm:$0xff]   ;;  %vm703_vm0 = vcmask 130048   ;;  %vm1662_vm1 = vmmov 0  }
  0x47   :  { %v97_v49 = vpack.c.bf16 %v90_v47, %v83_v46  ;;  %v1465_v50 = vld [vmem:[#allocation4 + $0xb4] ss:$8 sps:$4 sm:$0xff]   ;;  %v85_v52 = vld [vmem:[#allocation2 + $0x18] sm:$0xff]  ;;  %v92_v53 = vld [vmem:[#allocation2 + $0x50] sm:$0xff] }
  0x48   :  { %716 = vmatpush1.bf16.msra.mxu0 %v1419_v18  ;;  %v1468_v54 = vld [vmem:[#allocation4 + $0x1b4] ss:$8 sps:$4 sm:$0xff]   ;;  %v99_v55 = vpack.c.bf16 %v92_v53, %v85_v52  ;;  %v1467_v56 = vld [vmem:[#allocation4 + $0xb0] ss:$8 sps:$4 sm:$0xff]   ;;  %v1471_v57 = vld [vmem:[#allocation4 + $0xa4] ss:$8 sps:$4 sm:$0xff]  }
  0x49   :  { %717 = vmatprep.subr.bf16.mxu0 %v1423_v19  ;;  %759 = vmatpush1.bf16.msra.mxu1 %v1422_v20  ;;  %v1470_v58 = vld [vmem:[#allocation4 + $0x1b0] ss:$8 sps:$4 sm:$0xff]   ;;  %v1474_v59 = vld [vmem:[#allocation4 + $0x1a4] ss:$8 sps:$4 sm:$0xff]   ;;  %v1473_v60 = vld [vmem:[#allocation4 + $0xa0] ss:$8 sps:$4 sm:$0xff]  }
  0x4a   :  { %760 = vmatprep.subr.bf16.mxu1 %v1426_v21  ;;  %739 = vmatprep.mubr.bf16.mxu0 %v97_v49  ;;  %v1477_v61 = vld [vmem:[#allocation4 + $0x94] ss:$8 sps:$4 sm:$0xff]   ;;  %v1476_v62 = vld [vmem:[#allocation4 + $0x1a0] ss:$8 sps:$4 sm:$0xff]   ;;  %v1479_v0 = vld [vmem:[#allocation4 + $0x90] ss:$8 sps:$4 sm:$0xff]  }
  0x4b   :  { %782 = vmatprep.mubr.bf16.mxu1 %v99_v55  ;;  %v1480_v63 = vld [vmem:[#allocation4 + $0x194] ss:$8 sps:$4 sm:$0xff]   ;;  %v1482_v1 = vld [vmem:[#allocation4 + $0x190] ss:$8 sps:$4 sm:$0xff]   ;;  %v1483_v2 = vld [vmem:[#allocation4 + $0x84] ss:$8 sps:$4 sm:$0xff]  }
  0x4c   :  { %718 = vmatpush1.bf16.msra.mxu0 %v1425_v22  ;;  %v1485_v3 = vld [vmem:[#allocation4 + $0x80] ss:$8 sps:$4 sm:$0xff]   ;;  %v1486_v4 = vld [vmem:[#allocation4 + $0x184] ss:$8 sps:$4 sm:$0xff]   ;;  %v82_v5 = vld [vmem:[#allocation2] sm:$0xff]  ;;  %v1660_v21 = vmov 0  }
  0x4d   :  { %719 = vmatprep.subr.bf16.mxu0 %v1429_v23  ;;  %761 = vmatpush1.bf16.msra.mxu1 %v1428_v24  ;;  %v1488_v6 = vld [vmem:[#allocation4 + $0x180] ss:$8 sps:$4 sm:$0xff]   ;;  %v1491_v8 = vld [vmem:[#allocation4 + $0x274] ss:$8 sps:$4 sm:$0xff]   ;;  %v1489_v12 = vld [vmem:[#allocation4 + $0x270] ss:$8 sps:$4 sm:$0xff]  }
  0x4e   :  { %762 = vmatprep.subr.bf16.mxu1 %v1432_v25  ;;  %v89_v7 = vld [vmem:[#allocation2 + $0x38] sm:$0xff]  ;;  %v84_v9 = vld [vmem:[#allocation2 + $0x10] sm:$0xff]  ;;  %v91_v10 = vld [vmem:[#allocation2 + $0x48] sm:$0xff] }
  0x4f   :  { %v96_v11 = vpack.c.bf16 %v89_v7, %v82_v5  ;;  %v98_v13 = vpack.c.bf16 %v91_v10, %v84_v9  ;;  %v1494_v14 = vld [vmem:[#allocation4 + $0x264] ss:$8 sps:$4 sm:$0xff]   ;;  %v1534_v15 = vld [vmem:[#allocation4 + $0x300] ss:$8 sps:$4 sm:$0xff]   ;;  %v1497_v18 = vld [vmem:[#allocation4 + $0x254] ss:$8 sps:$4 sm:$0xff]   ;;  %v203_v9 = vlaneseq }
  0x50   :  { %720 = vmatpush1.bf16.msra.mxu0 %v1431_v26  ;;  %v1536_v16 = vld [vmem:[#allocation4 + $0x304] ss:$8 sps:$4 sm:$0xff]   ;;  %v1492_v17 = vld [vmem:[#allocation4 + $0x260] ss:$8 sps:$4 sm:$0xff]   ;;  %v87_v19 = vld [vmem:[#allocation2 + $0x28] sm:$0xff] }
  0x51   :  { %721 = vmatprep.subr.bf16.mxu0 %v1435_v27  ;;  %763 = vmatpush1.bf16.msra.mxu1 %v1434_v28  ;;  %v1495_v20 = vld [vmem:[#allocation4 + $0x250] ss:$8 sps:$4 sm:$0xff]   ;;  %v88_v22 = vld [vmem:[#allocation2 + $0x30] sm:$0xff]  ;;  %v1533_v49 = vld [vmem:[#allocation4 + $0x294] ss:$8 sps:$4 sm:$0xff]  }
  0x52   :  { %764 = vmatprep.subr.bf16.mxu1 %v1438_v29  ;;  %v95_v23 = vld [vmem:[#allocation2 + $0x68] sm:$0xff]  ;;  %v94_v24 = vld [vmem:[#allocation2 + $0x60] sm:$0xff]  ;;  %v1500_v25 = vld [vmem:[#allocation4 + $0x244] ss:$8 sps:$4 sm:$0xff]  }
  0x53   :  { %v101_v26 = vpack.c.bf16 %v94_v24, %v87_v19  ;;  %v102_v27 = vpack.c.bf16 %v95_v23, %v88_v22  ;;  %v1498_v28 = vld [vmem:[#allocation4 + $0x240] ss:$8 sps:$4 sm:$0xff]   ;;  %v1503_v29 = vld [vmem:[#allocation4 + $0x234] ss:$8 sps:$4 sm:$0xff]   ;;  %v1525_v46 = vld [vmem:[#allocation4 + $0x2b0] ss:$8 sps:$4 sm:$0xff]  }
  0x54   :  { %722 = vmatpush1.bf16.msra.mxu0 %v1437_v30  ;;  %v1501_v30 = vld [vmem:[#allocation4 + $0x230] ss:$8 sps:$4 sm:$0xff]   ;;  %v1530_v47 = vld [vmem:[#allocation4 + $0x2a4] ss:$8 sps:$4 sm:$0xff]   ;;  %v1537_v52 = vld [vmem:[#allocation4 + $0x280] ss:$8 sps:$4 sm:$0xff]  }
  0x55   :  { %723 = vmatprep.subr.bf16.mxu0 %v1441_v31  ;;  %765 = vmatpush1.bf16.msra.mxu1 %v1440_v32  ;;  %v1506_v31 = vld [vmem:[#allocation4 + $0x224] ss:$8 sps:$4 sm:$0xff]   ;;  %v1504_v32 = vld [vmem:[#allocation4 + $0x220] ss:$8 sps:$4 sm:$0xff]   ;;  %v86_v53 = vld [vmem:[#allocation2 + $0x20] sm:$0xff] }
  0x56   :  { %766 = vmatprep.subr.bf16.mxu1 %v1444_v33  ;;  %v1509_v33 = vld [vmem:[#allocation4 + $0x214] ss:$8 sps:$4 sm:$0xff]  }
  0x57   :  { %v1553_v5 = vld [vmem:[#allocation6 + $0x8] sm:$0xff]   ;;  %v1555_v7 = vld [vmem:[#allocation6] sm:$0xff]  }
  0x58   :  { %724 = vmatpush2.bf16.msra.mxu0 %v1443_v34  ;;  %v1507_v34 = vld [vmem:[#allocation4 + $0x210] ss:$8 sps:$4 sm:$0xff]  }
  0x59   :  { %725 = vmatprep.subr.bf16.mxu0 %v1447_v35  ;;  %767 = vmatpush2.bf16.msra.mxu1 %v1446_v36  ;;  %v1512_v35 = vld [vmem:[#allocation4 + $0x204] ss:$8 sps:$4 sm:$0xff]   ;;  %v1510_v36 = vld [vmem:[#allocation4 + $0x200] ss:$8 sps:$4 sm:$0xff]  }
  0x5a   :  { %768 = vmatprep.subr.bf16.mxu1 %v1450_v37  ;;  %v1515_v37 = vld [vmem:[#allocation4 + $0x2f4] ss:$8 sps:$4 sm:$0xff]  }
  0x5c   :  { %726 = vmatpush2.bf16.msra.mxu0 %v1449_v38  ;;  %v1513_v38 = vld [vmem:[#allocation4 + $0x2f0] ss:$8 sps:$4 sm:$0xff]  }
  0x5d   :  { %727 = vmatprep.subr.bf16.mxu0 %v1453_v39  ;;  %769 = vmatpush2.bf16.msra.mxu1 %v1452_v40  ;;  %v1518_v39 = vld [vmem:[#allocation4 + $0x2e4] ss:$8 sps:$4 sm:$0xff]   ;;  %v1516_v40 = vld [vmem:[#allocation4 + $0x2e0] ss:$8 sps:$4 sm:$0xff]  }
  0x5e   :  { %770 = vmatprep.subr.bf16.mxu1 %v1456_v41  ;;  %v1521_v41 = vld [vmem:[#allocation4 + $0x2d4] ss:$8 sps:$4 sm:$0xff]  }
  0x60   :  { %728 = vmatpush2.bf16.msra.mxu0 %v1455_v42  ;;  %v1519_v42 = vld [vmem:[#allocation4 + $0x2d0] ss:$8 sps:$4 sm:$0xff]  }
  0x61   :  { %729 = vmatprep.subr.bf16.mxu0 %v1459_v43  ;;  %771 = vmatpush2.bf16.msra.mxu1 %v1458_v44  ;;  %v1524_v43 = vld [vmem:[#allocation4 + $0x2c4] ss:$8 sps:$4 sm:$0xff]   ;;  %v1522_v44 = vld [vmem:[#allocation4 + $0x2c0] ss:$8 sps:$4 sm:$0xff]  }
  0x62   :  { %772 = vmatprep.subr.bf16.mxu1 %v1462_v45  ;;  %v1527_v45 = vld [vmem:[#allocation4 + $0x2b4] ss:$8 sps:$4 sm:$0xff]  }
  0x64   :  { %730 = vmatpush2.bf16.msra.mxu0 %v1461_v48  ;;  %v1528_v48 = vld [vmem:[#allocation4 + $0x2a0] ss:$8 sps:$4 sm:$0xff]  }
  0x65   :  { %731 = vmatprep.subr.bf16.mxu0 %v1465_v50  ;;  %773 = vmatpush2.bf16.msra.mxu1 %v1464_v51  ;;  %v1531_v50 = vld [vmem:[#allocation4 + $0x290] ss:$8 sps:$4 sm:$0xff]   ;;  %v1539_v51 = vld [vmem:[#allocation4 + $0x284] ss:$8 sps:$4 sm:$0xff]  }
  0x66   :  { %774 = vmatprep.subr.bf16.mxu1 %v1468_v54  ;;  %v93_v54 = vld [vmem:[#allocation2 + $0x58] sm:$0xff] }
  0x67   :  { %v100_v55 = vpack.c.bf16 %v93_v54, %v86_v53  ;;  %v1556_v53 = vld [vmem:[#allocation7 + $0x38] sm:$0xff]  }
  0x68   :  { %732 = vmatpush2.bf16.msra.mxu0 %v1467_v56  ;;  %v1540_v56 = vld [vmem:[#allocation6 + $0x78] sm:$0xff]  }
  0x69   :  { %733 = vmatprep.subr.bf16.mxu0 %v1471_v57  ;;  %775 = vmatpush2.bf16.msra.mxu1 %v1470_v58  ;;  %v1541_v57 = vld [vmem:[#allocation6 + $0x38] sm:$0xff]   ;;  %v1542_v58 = vld [vmem:[#allocation6 + $0x70] sm:$0xff]  }
  0x6a   :  { %776 = vmatprep.subr.bf16.mxu1 %v1474_v59  ;;  %v1543_v59 = vld [vmem:[#allocation6 + $0x30] sm:$0xff]  }
  0x6c   :  { %734 = vmatpush2.bf16.msra.mxu0 %v1473_v60  ;;  %v1544_v60 = vld [vmem:[#allocation6 + $0x68] sm:$0xff]  }
  0x6d   :  { %735 = vmatprep.subr.bf16.mxu0 %v1477_v61  ;;  %777 = vmatpush2.bf16.msra.mxu1 %v1476_v62  ;;  %v1545_v61 = vld [vmem:[#allocation6 + $0x28] sm:$0xff]   ;;  %v1546_v62 = vld [vmem:[#allocation6 + $0x60] sm:$0xff]  }
  0x6e   :  { %778 = vmatprep.subr.bf16.mxu1 %v1480_v63  ;;  %v1547_v63 = vld [vmem:[#allocation6 + $0x20] sm:$0xff]  }
  0x70   :  { %736 = vmatpush2.bf16.msra.mxu0 %v1479_v0  ;;  %v1548_v0 = vld [vmem:[#allocation6 + $0x58] sm:$0xff]  }
  0x71   :  { %737 = vmatprep.subr.bf16.mxu0 %v1483_v2  ;;  %779 = vmatpush2.bf16.msra.mxu1 %v1482_v1  ;;  %v1549_v1 = vld [vmem:[#allocation6 + $0x18] sm:$0xff]   ;;  %v1550_v2 = vld [vmem:[#allocation6 + $0x50] sm:$0xff]  }
  0x72   :  { %780 = vmatprep.subr.bf16.mxu1 %v1486_v4  ;;  %v1552_v4 = vld [vmem:[#allocation6 + $0x48] sm:$0xff]  }
  0x74   :  { %738 = vmatpush2.bf16.msra.mxu0 %v1485_v3  ;;  %v1551_v3 = vld [vmem:[#allocation6 + $0x10] sm:$0xff]  }
  0x75   :  { %793 = vmatprep.subr.bf16.mxu0 %v1491_v8  ;;  %781 = vmatpush2.bf16.msra.mxu1 %v1488_v6  ;;  %v1554_v6 = vld [vmem:[#allocation6 + $0x40] sm:$0xff]   ;;  %v1661_v8 = vmov 0.0  }
  0x76   :  { %850 = vmatprep.subr.bf16.mxu1 %v1536_v16 }
  0x77   :  { %740 = vmatmul.mubr.bf16.vlgmr.msra.gmra.mxu0 %v96_v11  ;;  %v204_v11 = vshrl.u32 %v203_v9, 7 }
  0x78   :  { %794 = vmatpush1.bf16.msra.mxu0 %v1489_v12  ;;  %783 = vmatmul.mubr.bf16.vlgmr.msra.gmra.mxu1 %v98_v13 }
  0x79   :  { %795 = vmatprep.subr.bf16.mxu0 %v1494_v14  ;;  %868 = vmatprep.mubr.bf16.mxu1 %v1660_v21  ;;  %v209_v14 = vsub.s32 1, %v204_v11  ;;  %v205_v16 = vsub.s32 0, %v204_v11 }
  0x7a   :  { %851 = vmatpush1.bf16.msra.mxu1 %v1534_v15  ;;  %825 = vmatprep.mubr.bf16.mxu0 %v101_v26  ;;  %v201_v15 = vld [vmem:[%s1738_s2] sm:$0x3] }
  0x7b   :  { %1329 = vmatprep.subr.bf16.mxu1 %v1540_v56  ;;  %v210_v19 = vrot.slane %v201_v15, %v209_v14  ;;  %v1558_v56 = vld [vmem:[#allocation7 + $0x28] sm:$0xff]  }
  0x7c   :  { %796 = vmatpush1.bf16.msra.mxu0 %v1492_v17 }
  0x7d   :  { %797 = vmatprep.subr.bf16.mxu0 %v1497_v18 }
  0x80   :  { %798 = vmatpush1.bf16.msra.mxu0 %v1495_v20  ;;  %1293 = vmatmul.mubr.msk.bf16.vlgmr.msra.gmra.mxu1 %vm703_vm0, %v102_v27  ;;  %v206_v20 = vrot.slane %v201_v15, %v205_v16 }
  0x81   :  { %799 = vmatprep.subr.bf16.mxu0 %v1500_v25  ;;  %1330 = vmatpush3.bf16.msra.mxu1 %v1541_v57  ;;  %v1559_v57 = vld [vmem:[#allocation7 + $0x20] sm:$0xff]  }
  0x82   :  { %1331 = vmatprep.subr.bf16.mxu1 %v1542_v58  ;;  %v1560_v58 = vld [vmem:[#allocation7 + $0x18] sm:$0xff]  }
  0x84   :  { %800 = vmatpush1.bf16.msra.mxu0 %v1498_v28 }
  0x85   :  { %801 = vmatprep.subr.bf16.mxu0 %v1503_v29  ;;  %1332 = vmatpush3.bf16.msra.mxu1 %v1543_v59  ;;  %v1561_v59 = vld [vmem:[#allocation7 + $0x10] sm:$0xff]  }
  0x86   :  { %1333 = vmatprep.subr.bf16.mxu1 %v1544_v60  ;;  %v1562_v60 = vld [vmem:[#allocation7 + $0x8] sm:$0xff]  }
  0x88   :  { %802 = vmatpush1.bf16.msra.mxu0 %v1501_v30 }
  0x89   :  { %803 = vmatprep.subr.bf16.mxu0 %v1506_v31  ;;  %1334 = vmatpush3.bf16.msra.mxu1 %v1545_v61  ;;  %v1563_v61 = vld [vmem:[#allocation7] sm:$0xff]  }
  0x8a   :  { %1335 = vmatprep.subr.bf16.mxu1 %v1546_v62 }
  0x8c   :  { %804 = vmatpush1.bf16.msra.mxu0 %v1504_v32 }
  0x8d   :  { %805 = vmatprep.subr.bf16.mxu0 %v1509_v33  ;;  %1336 = vmatpush3.bf16.msra.mxu1 %v1547_v63 }
  0x8e   :  { %1337 = vmatprep.subr.bf16.mxu1 %v1548_v0 }
  0x90   :  { %806 = vmatpush1.bf16.msra.mxu0 %v1507_v34 }
  0x91   :  { %807 = vmatprep.subr.bf16.mxu0 %v1512_v35  ;;  %1338 = vmatpush3.bf16.msra.mxu1 %v1549_v1  ;;  %v1294_v1 = vld [vmem:[%s1740_s4] ss:$0 sm:$0xff] }
  0x92   :  { %1339 = vmatprep.subr.bf16.mxu1 %v1550_v2 }
  0x94   :  { %808 = vmatpush1.bf16.msra.mxu0 %v1510_v36 }
  0x95   :  { %809 = vmatprep.subr.bf16.mxu0 %v1515_v37  ;;  %1340 = vmatpush3.bf16.msra.mxu1 %v1551_v3 }
  0x96   :  { %1341 = vmatprep.subr.bf16.mxu1 %v1552_v4 }
  0x98   :  { %810 = vmatpush2.bf16.msra.mxu0 %v1513_v38 }
  0x99   :  { %811 = vmatprep.subr.bf16.mxu0 %v1518_v39  ;;  %1342 = vmatpush3.bf16.msra.mxu1 %v1553_v5 }
  0x9a   :  { %1343 = vmatprep.subr.bf16.mxu1 %v1554_v6 }
  0x9c   :  { %812 = vmatpush2.bf16.msra.mxu0 %v1516_v40 }
  0x9d   :  { %813 = vmatprep.subr.bf16.mxu0 %v1521_v41  ;;  %1344 = vmatpush3.bf16.msra.mxu1 %v1555_v7 }
  0x9e   :  { %1360 = vmatprep.subr.bf16.mxu1 %v1661_v8 }
  0xa0   :  { %814 = vmatpush2.bf16.msra.mxu0 %v1519_v42 }
  0xa1   :  { %815 = vmatprep.subr.bf16.mxu0 %v1524_v43 }
  0xa4   :  { %816 = vmatpush2.bf16.msra.mxu0 %v1522_v44 }
  0xa5   :  { %817 = vmatprep.subr.bf16.mxu0 %v1527_v45 }
  0xa8   :  { %818 = vmatpush2.bf16.msra.mxu0 %v1525_v46 }
  0xa9   :  { %819 = vmatprep.subr.bf16.mxu0 %v1530_v47 }
  0xac   :  { %820 = vmatpush2.bf16.msra.mxu0 %v1528_v48 }
  0xad   :  { %821 = vmatprep.subr.bf16.mxu0 %v1533_v49 }
  0xb0   :  { %822 = vmatpush2.bf16.msra.mxu0 %v1531_v50 }
  0xb1   :  { %823 = vmatprep.subr.bf16.mxu0 %v1539_v51 }
  0xb4   :  { %824 = vmatpush2.bf16.msra.mxu0 %v1537_v52 }
  0xb7   :  { %826 = vmatmul.mubr.bf16.vlgmr.msra.gmra.mxu0 %v100_v55  ;;  %v1557_v55 = vld [vmem:[#allocation7 + $0x30] sm:$0xff]  }
 0x137   :  { %v741_v12 = vpop.f32.mrf.mxu0 }
 0x138   :  { %v784_v10 = vpop.f32.mrf.mxu1  ;;  %v742_v25 = vadd.f32 %v741_v12, %v206_v20 }
 0x139   :  { %v743_v17 = vpop.f32.mrf.mxu0 }
 0x13a   :  { %v786_v13 = vpop.f32.mrf.mxu1  ;;  %v744_v24 = vadd.f32 %v743_v17, %v210_v19  ;;  %v785_v32 = vadd.f32 %v784_v10, %v742_v25 }
 0x13b   :  { %v745_v21 = vpop.f32.mrf.mxu0 }
 0x13c   :  { %v788_v18 = vpop.f32.mrf.mxu1  ;;  %v746_v27 = vadd.f32 %v745_v21, %v206_v20  ;;  %v787_v30 = vadd.f32 %v786_v13, %v744_v24 }
 0x13d   :  { %v747_v26 = vpop.f32.mrf.mxu0 }
 0x13e   :  { %v790_v22 = vpop.f32.mrf.mxu1  ;;  %v748_v31 = vadd.f32 %v747_v26, %v210_v19  ;;  %v789_v34 = vadd.f32 %v788_v18, %v746_v27 }
 0x140   :  { %v870_v23 = vpop.f32.mrf.mxu1  ;;  %v791_v39 = vadd.f32 %v790_v22, %v748_v31 }
 0x142   :  { %v872_v28 = vpop.f32.mrf.mxu1 }
 0x144   :  { %v874_v37 = vpop.f32.mrf.mxu1 }
 0x146   :  { %v876_v46 = vpop.f32.mrf.mxu1 }
 0x177   :  { %v827_v29 = vpop.f32.mrf.mxu0 }
 0x178   :  { %v828_v36 = vadd.f32 %v827_v29, %v785_v32 }
 0x179   :  { %v829_v33 = vpop.f32.mrf.mxu0 }
 0x17a   :  { %v830_v35 = vadd.f32 %v829_v33, %v787_v30  ;;  %v871_v45 = vadd.f32 %v870_v23, %v828_v36 }
 0x17b   :  { %v831_v38 = vpop.f32.mrf.mxu0 }
 0x17c   :  { %v832_v40 = vadd.f32 %v831_v38, %v789_v34  ;;  %v873_v42 = vadd.f32 %v872_v28, %v830_v35  ;;  %v879_v51 = vmax.f32 %v871_v45, 0.0 }
 0x17d   :  { %v833_v41 = vpop.f32.mrf.mxu0 }
 0x17e   :  { %v875_v43 = vadd.f32 %v874_v37, %v832_v40  ;;  %v834_v44 = vadd.f32 %v833_v41, %v791_v39  ;;  %v880_v49 = vmax.f32 %v873_v42, 0.0 }
 0x180   :  { %v877_v47 = vadd.f32 %v876_v46, %v834_v44  ;;  %v881_v48 = vmax.f32 %v875_v43, 0.0 }
 0x182   :  { %v882_v50 = vmax.f32 %v877_v47, 0.0  ;;  %v883_v54 = vpack.c.bf16 %v881_v48, %v879_v51 }
 0x184   :  { %v884_v52 = vpack.c.bf16 %v882_v50, %v880_v49 }
 0x186   :  { %1052 = vmatprep.mubr.bf16.mxu1 %v884_v52 }
 0x187   :  { %1053 = vmatmul.mubr.bf16.vlgmr.msra.gmra.mxu1 %v883_v54 }
 0x188   :  { %1361 = vmatpush3.bf16.msra.mxu1 %v1556_v53  ;;  %1376 = vmatprep.mubr.msk.bf16.mxu1 %vm1662_vm1, %v1661_v8 }
 0x189   :  { %1362 = vmatprep.subr.bf16.mxu1 %v1661_v8 }
 0x18c   :  { %1363 = vmatpush3.bf16.msra.mxu1 %v1557_v55 }
 0x18d   :  { %1364 = vmatprep.subr.bf16.mxu1 %v1661_v8 }
 0x190   :  { %1365 = vmatpush3.bf16.msra.mxu1 %v1558_v56 }
 0x191   :  { %1366 = vmatprep.subr.bf16.mxu1 %v1661_v8 }
 0x194   :  { %1367 = vmatpush3.bf16.msra.mxu1 %v1559_v57 }
 0x195   :  { %1368 = vmatprep.subr.bf16.mxu1 %v1661_v8 }
 0x198   :  { %1369 = vmatpush3.bf16.msra.mxu1 %v1560_v58 }
 0x199   :  { %1370 = vmatprep.subr.bf16.mxu1 %v1661_v8 }
 0x19c   :  { %1371 = vmatpush3.bf16.msra.mxu1 %v1561_v59 }
 0x19d   :  { %1372 = vmatprep.subr.bf16.mxu1 %v1661_v8 }
 0x1a0   :  { %1373 = vmatpush3.bf16.msra.mxu1 %v1562_v60 }
 0x1a1   :  { %1374 = vmatprep.subr.bf16.mxu1 %v1661_v8  ;;  %v1311_v8 = vld [vmem:[%s1742_s6] ss:$0 sm:$0xff] }
 0x1a4   :  { %1375 = vmatpush3.bf16.msra.mxu1 %v1563_v61 }
 0x247   :  { %v1345_v62 = vpop.f32.mrf.mxu1 }
 0x249   :  { %v1346_v63 = vpop.f32.mrf.mxu1 }
 0x24a   :  { %v1347_v0 = vadd.f32 %v1346_v63, %v1345_v62 }
 0x24b   :  { %v1348_v2 = vpop.f32.mrf.mxu1 }
 0x24c   :  { %v1055_v4 = vadd.f32 %v1347_v0, %v1294_v1 }
 0x24d   :  { %v1349_v3 = vpop.f32.mrf.mxu1 }
 0x24e   :  { %v1350_v5 = vadd.f32 %v1349_v3, %v1348_v2  ;;  %v1061_v7 = vmax.f32 %v1055_v4, 0.0 }
 0x250   :  { %v1058_v6 = vadd.f32 %v1350_v5, %v1294_v1 }
 0x252   :  { %v1062_v9 = vmax.f32 %v1058_v6, 0.0 }
 0x254   :  { %v1063_v10 = vpack.c.bf16 %v1062_v9, %v1061_v7 }
 0x256   :  { %1377 = vmatmul.mubr.bf16.vlgmr.msra.gmra.mxu1 %v1063_v10 }
 0x316   :  { %v1169_v11 = vpop.f32.mrf.mxu1 }
 0x317   :  { %v1170_v13 = vadd.f32 %v1311_v8, %v1169_v11 }
 0x318   :  { %v1378_v12 = vpop.f32.mrf.mxu1 }
 0x319   :  { %v1176_v17 = vmax.f32 %v1170_v13, 0.0 }
 0x31a   :  { %v1172_v14 = vpop.f32.mrf.mxu1 }
 0x31b   :  { %v1173_v15 = vadd.f32 %v1311_v8, %v1172_v14 }
 0x31c   :  { %v1379_v16 = vpop.f32.mrf.mxu1 }
 0x31d   :  { %v1177_v18 = vmax.f32 %v1173_v15, 0.0 }
 0x31f   :  { %v1327_v19 = vpack.c.bf16 %v1177_v18, %v1176_v17 }
 0x321   :  { %1328 = vst [vmem:[%s1743_s7] sm:$0xff] %v1327_v19  }
 0x322   :  { %1192 = vsyncpa [#allocation3], 1 }
 0x323   :  { %1193 = vsyncpa [#allocation5], 1 }
 0x324   :  { %1194 = vsyncpa [#allocation8], 1 }

</bundles_post_ra>
